<compile_context>
chip_gen: v7x
topology: tpu7x:2x2x1
jax: 0.10.0
libtpu: 0.0.40
codegen_flags: <defaults>
</compile_context>

<pallas_src>
import functools

import jax
import jax.numpy as jnp
from jax.experimental import pallas as pl
from jax.experimental.pallas import tpu as pltpu

_VMEM_HEADROOM = 8 << 20  # leave room for the compiler's own scratch


def _round_up(a: int, b: int) -> int:
    return (a + b - 1) // b * b


@functools.lru_cache(maxsize=1)
def _vmem_capacity_bytes() -> int:
    """Per-TensorCore VMEM: 128 MiB on v5e/v6e, 64 MiB on v7x."""
    try:
        cap = int(pltpu.get_tpu_info().vmem_capacity_bytes)
        if cap > 0:
            return cap
    except Exception:
        pass
    return 64 << 20  # conservative fallback (v7x)


def _vmem_estimate(tm, tf, dm_p, out_bytes, wbuf=2):
    bf16, f32 = 2, 4
    return (2 * tm * dm_p * bf16          # x tile (double buffered)
            + wbuf * dm_p * tf * bf16     # w1 tile
            + wbuf * tf * dm_p * bf16     # w2 tile
            + wbuf * 8 * tf * f32         # b1 slice (sublane padded)
            + 2 * 8 * dm_p * f32          # b2
            + 2 * tm * dm_p * out_bytes   # out tile
            + tm * dm_p * f32             # accumulator scratch
            + tm * tf * f32)              # live ReLU intermediate


def _select_tf(d_model, d_ff, tm_req, tf_req, wbuf):
    """d_ff tile.  Depends only on static weight shapes / kwargs, so weights
    can be padded+cast once (prepare_ffn_params) outside the per-call path."""
    dm_p = _round_up(d_model, 128)
    dff_ceil = _round_up(d_ff, 128)
    tf = tf_req
    # Wide d_model: shrink tf so the two weight tiles stay double buffered
    # even under v7x's 64 MiB VMEM.
    if dm_p >= 4096:
        tf = min(tf, 256)
    elif dm_p >= 2048:
        tf = min(tf, 512)
    tf = max(128, min(_round_up(tf, 128), dff_ceil))
    # Generation-aware VMEM fit, assuming the largest possible row tile and a
    # conservative 4-byte output.
    tm_cap = max(256, _round_up(tm_req, 256))
    budget = _vmem_capacity_bytes() - _VMEM_HEADROOM
    while _vmem_estimate(tm_cap, tf, dm_p, 4, wbuf) > budget and tf > 128:
        tf = max(128, _round_up(tf // 2, 128))
    return tf, dm_p


def _select_tm(M, tm_req, tf, dm_p, out_bytes, wbuf):
    # MXU-aligned row tile: multiple of 256 when M allows (2x256 MXU height),
    # else 128, else the 16-row sublane minimum.
    if M >= 256:
        tm = min(_round_up(tm_req, 256), _round_up(M, 256))
    elif M >= 128:
        tm = 128
    else:
        tm = _round_up(max(M, 16), 16)
    # Megacore (v7x, 2 TensorCores): prefer >= 2 row tiles on the parallel axis.
    if _round_up(M, tm) // tm < 2 and tm >= 512:
        tm //= 2
    # Final VMEM fit for the actual output dtype.
    budget = _vmem_capacity_bytes() - _VMEM_HEADROOM
    while _vmem_estimate(tm, tf, dm_p, out_bytes, wbuf) > budget and tm > 256:
        tm = max(256, _round_up(tm // 2, 128))
    return tm


def _pad_cast_2d(a, rows, cols, dtype):
    """Cast/pad only when needed (no HBM round trip in the aligned case)."""
    if a.dtype != dtype:
        a = a.astype(dtype)
    pr, pc = rows - a.shape[0], cols - a.shape[1]
    if pr or pc:
        a = jnp.pad(a, ((0, pr), (0, pc)))
    return a


def prepare_ffn_params(w1, b1, w2, b2, *, tm=1024, tf=1024, weight_buffers=2):
    """Pad + cast the call-invariant weights ONCE (hoisted out of the hot path).

    w1: (d_model, d_ff), w2: (d_ff, d_model)  -- i.e. torch weights transposed
    so the kernel computes plain x @ W + b.  Pass the same tm/tf/weight_buffers
    to feed_forward so its pad/cast steps become no-ops.
    """
    d_model, d_ff = w1.shape
    tf_, dm_p = _select_tf(d_model, d_ff, tm, tf, weight_buffers)
    dff_p = _round_up(d_ff, tf_)
    w1_p = _pad_cast_2d(w1, dm_p, dff_p, jnp.bfloat16)
    b1_p = _pad_cast_2d(b1.reshape(1, -1), 1, dff_p, jnp.float32)
    w2_p = _pad_cast_2d(w2, dff_p, dm_p, jnp.bfloat16)
    b2_p = _pad_cast_2d(b2.reshape(1, -1), 1, dm_p, jnp.float32)
    return w1_p, b1_p, w2_p, b2_p


def _ffn_kernel(x_ref, w1_ref, b1_ref, w2_ref, b2_ref, o_ref, acc_ref):
    # x_ref  : (tm, dm_p)   bf16 token tile (resident across k)
    # w1_ref : (dm_p, tf)   bf16 weight tile (serpentine walk along d_ff)
    # b1_ref : (1, tf)      f32 bias slice for this d_ff tile
    # w2_ref : (tf, dm_p)   bf16 weight tile (serpentine walk along d_ff)
    # b2_ref : (1, dm_p)    f32, constant across the grid
    # o_ref  : (tm, dm_p)   output tile (written on the last k step only)
    # acc_ref: (tm, dm_p)   f32 accumulator scratch
    k = pl.program_id(1)

    @pl.when(k == 0)
    def _init():
        acc_ref[...] = jnp.zeros_like(acc_ref)

    # First GEMM for this d_ff tile: (tm, dm) @ (dm, tf) -> f32 on the MXU.
    h = jnp.dot(x_ref[...], w1_ref[...], preferred_element_type=jnp.float32)
    # Bias + ReLU in f32 on the VPU.  Dropout == identity (eval mode).
    h = jnp.maximum(h + b1_ref[...], 0.0)
    # Second GEMM partial sum: (tm, tf) @ (tf, dm), f32 accumulation.
    acc_ref[...] += jnp.dot(h.astype(w2_ref.dtype), w2_ref[...],
                            preferred_element_type=jnp.float32)

    @pl.when(k == pl.num_programs(1) - 1)
    def _finalize():
        # b2 added exactly once, in the epilogue (never accumulated).
        o_ref[...] = (acc_ref[...] + b2_ref[...]).astype(o_ref.dtype)


@functools.partial(
    jax.jit, static_argnames=("tm", "tf", "out_dtype", "weight_buffers"))
def feed_forward(x, w1, b1, w2, b2, *, tm=1024, tf=1024, out_dtype=None,
                 weight_buffers=2):
    """x: (B, S, d_model) -> (B, S, d_model).

    Weights are (in_features, out_features); they may be raw or pre-prepared
    via prepare_ffn_params (then padding/casting below is skipped entirely).
    out_dtype: override output dtype (e.g. jnp.bfloat16 inside a bf16 model).
    weight_buffers: 2 = standard double buffering; 3 = deeper weight pipeline
    (use when DMA is exposed and VMEM allows).
    """
    B, S, d_model = x.shape
    M = B * S
    out_dt = jnp.dtype(out_dtype) if out_dtype is not None else x.dtype
    out_bytes = out_dt.itemsize

    # ---- tile selection (generation-aware VMEM budget, MXU aligned) ----
    d_ff_seen = w1.shape[1]
    tf_, dm_p = _select_tf(d_model, d_ff_seen, tm, tf, weight_buffers)
    dff_p = _round_up(d_ff_seen, tf_)
    tm_ = _select_tm(M, tm, tf_, dm_p, out_bytes, weight_buffers)
    M_p = _round_up(M, tm_)
    nk = dff_p // tf_
    grid = (M_p // tm_, nk)  # reduction (d_ff) axis last

    # ---- operands: pad/cast only when needed (zero padding keeps math exact)
    x_p = _pad_cast_2d(x.reshape(M, d_model), M_p, dm_p, jnp.bfloat16)
    w1_p = _pad_cast_2d(w1, dm_p, dff_p, jnp.bfloat16)
    b1_p = _pad_cast_2d(b1.reshape(1, -1), 1, dff_p, jnp.float32)
    w2_p = _pad_cast_2d(w2, dff_p, dm_p, jnp.bfloat16)
    b2_p = _pad_cast_2d(b2.reshape(1, -1), 1, dm_p, jnp.float32)

    est = _vmem_estimate(tm_, tf_, dm_p, out_bytes, weight_buffers)
    budget = _vmem_capacity_bytes() - _VMEM_HEADROOM
    vmem_limit = int(min(max(est * 5 // 4, 32 << 20), budget))

    def _ks(i, k):
        # Serpentine over d_ff: forward on even row tiles, backward on odd
        # ones.  The boundary weight tile is identical across the i -> i+1
        # transition, so Pallas skips that DMA (saves ~1/nk of weight traffic).
        r = i % 2
        return k + r * (nk - 1 - 2 * k)

    wkw = ({"pipeline_mode": pl.Buffered(weight_buffers)}
           if weight_buffers > 2 else {})
    in_specs = [
        # token tile: walks down the rows, resident across k
        pl.BlockSpec((tm_, dm_p), lambda i, k: (i, 0)),
        # w1 tile: serpentine walk along d_ff
        pl.BlockSpec((dm_p, tf_), lambda i, k: (0, _ks(i, k)), **wkw),
        # b1 slice: serpentine walk along d_ff
        pl.BlockSpec((1, tf_), lambda i, k: (0, _ks(i, k))),
        # w2 tile: serpentine walk along d_ff
        pl.BlockSpec((tf_, dm_p), lambda i, k: (_ks(i, k), 0), **wkw),
        # b2: constant
        pl.BlockSpec((1, dm_p), lambda i, k: (0, 0)),
    ]

    out2d = pl.pallas_call(
        _ffn_kernel,
        out_shape=jax.ShapeDtypeStruct((M_p, dm_p), out_dt),
        grid_spec=pltpu.PrefetchScalarGridSpec(
            num_scalar_prefetch=0,
            grid=grid,
            in_specs=in_specs,
            out_specs=pl.BlockSpec((tm_, dm_p), lambda i, k: (i, 0)),
            scratch_shapes=[pltpu.VMEM((tm_, dm_p), jnp.float32)],
        ),
        compiler_params=pltpu.CompilerParams(
            dimension_semantics=("parallel", "arbitrary"),
            vmem_limit_bytes=vmem_limit,
        ),
    )(x_p, w1_p, b1_p, w2_p, b2_p)

    if (M_p, dm_p) != (M, d_model):
        out2d = out2d[:M, :d_model]
    return out2d.reshape(B, S, d_model)


def _reference(x, w1, b1, w2, b2):
    h = jnp.maximum(jnp.einsum("bsd,df->bsf", x, w1) + b1, 0.0)
    return jnp.einsum("bsf,fd->bsd", h, w2) + b2


def _make_params(key, d_model, d_ff):
    k1, k2, k3, k4 = jax.random.split(key, 4)
    lim1 = 1.0 / (d_model ** 0.5)
    lim2 = 1.0 / (d_ff ** 0.5)
    # stored as (in, out) so the kernel does x @ W
    w1 = jax.random.uniform(k1, (d_model, d_ff), jnp.float32, -lim1, lim1)
    b1 = jax.random.uniform(k2, (d_ff,), jnp.float32, -lim1, lim1)
    w2 = jax.random.uniform(k3, (d_ff, d_model), jnp.float32, -lim2, lim2)
    b2 = jax.random.uniform(k4, (d_model,), jnp.float32, -lim2, lim2)
    return w1, b1, w2, b2


if __name__ == "__main__":
    key = jax.random.PRNGKey(0)

    # --- test 1: small, unaligned shapes (exercises the padding path) ---
    B, S, d_model, d_ff = 2, 8, 32, 64
    kx, kp = jax.random.split(key)
    x = jax.random.normal(kx, (B, S, d_model), dtype=jnp.float32)
    w1, b1, w2, b2 = _make_params(kp, d_model, d_ff)

    out = jax.block_until_ready(feed_forward(x, w1, b1, w2, b2))
    ref = _reference(x, w1, b1, w2, b2)
    assert out.shape == (B, S, d_model)
    # bf16 operands -> looser tolerance vs the f32 reference
    assert jnp.allclose(out, ref, atol=5e-2, rtol=5e-2), "mismatch (test 1)"

    # --- test 2: aligned shapes, multiple row tiles + multi-step d_ff
    #             accumulation (module's default d_ff), with weights prepared
    #             once outside the hot path (no per-call pad/cast traffic). ---
    B2, S2, dm2, dff2 = 2, 256, 128, 2048
    kx2, kp2 = jax.random.split(kp)
    x2 = jax.random.normal(kx2, (B2, S2, dm2), dtype=jnp.float32)
    p2 = _make_params(kp2, dm2, dff2)
    prepped2 = prepare_ffn_params(*p2)

    out2 = jax.block_until_ready(feed_forward(x2, *prepped2))
    ref2 = _reference(x2, *p2)
    assert out2.shape == (B2, S2, dm2)
    assert jnp.allclose(out2, ref2, atol=8e-2, rtol=8e-2), "mismatch (test 2)"

    print("KERNEL_OK")
</pallas_src>

<mosaic_0001>
module attributes {stable_mosaic.version = 11 : i64} {
  func.func @_ffn_kernel(%arg0: i32, %arg1: i32, %arg2: memref<16x128xbf16, #tpu.memory_space<vmem>>, %arg3: memref<128x128xbf16, #tpu.memory_space<vmem>>, %arg4: memref<1x128xf32, #tpu.memory_space<vmem>>, %arg5: memref<128x128xbf16, #tpu.memory_space<vmem>>, %arg6: memref<1x128xf32, #tpu.memory_space<vmem>>, %arg7: memref<16x128xf32, #tpu.memory_space<vmem>>, %arg8: memref<16x128xf32, #tpu.memory_space<vmem>>) attributes {dimension_semantics = [#tpu.dimension_semantics<parallel>, #tpu.dimension_semantics<arbitrary>], iteration_bounds = array<i64: 1, 1>, scalar_prefetch = 0 : i64, scratch_operands = 1 : i64, tpu.core_type = #tpu.core_type<tc>, window_params = [{transform_indices = @transform_0, window_bounds = array<i64: 16, 128>}, {transform_indices = @transform_1, window_bounds = array<i64: 128, 128>}, {transform_indices = @transform_2, window_bounds = array<i64: 1, 128>}, {transform_indices = @transform_3, window_bounds = array<i64: 128, 128>}, {pipeline_mode = #tpu.pipeline_mode<synchronous>, transform_indices = @transform_4, window_bounds = array<i64: 1, 128>}, {transform_indices = @transform_5, window_bounds = array<i64: 16, 128>}]} {
    %c0_i32 = arith.constant 0 : i32
    %0 = arith.cmpi eq, %arg1, %c0_i32 : i32
    %1 = arith.extui %0 : i1 to i32
    %c0_i32_0 = arith.constant 0 : i32
    %2 = arith.cmpi ne, %1, %c0_i32_0 : i32
    scf.if %2 {
      %cst_16 = arith.constant 0.000000e+00 : f32
      %20 = vector.broadcast %cst_16 : f32 to vector<16x128xf32>
      %c0_17 = arith.constant 0 : index
      %c0_18 = arith.constant 0 : index
      %21 = vector.load %arg8[%c0_17, %c0_18] : memref<16x128xf32, #tpu.memory_space<vmem>>, vector<16x128xf32>
      tpu.vector_store %arg8[%c0_17, %c0_18], %20 {strides = array<i32>} : memref<16x128xf32, #tpu.memory_space<vmem>>, vector<16x128xf32>,
    } else {
    }
    %c0 = arith.constant 0 : index
    %c0_1 = arith.constant 0 : index
    %3 = vector.load %arg2[%c0, %c0_1] : memref<16x128xbf16, #tpu.memory_space<vmem>>, vector<16x128xbf16>
    %c0_2 = arith.constant 0 : index
    %c0_3 = arith.constant 0 : index
    %4 = vector.load %arg3[%c0_2, %c0_3] : memref<128x128xbf16, #tpu.memory_space<vmem>>, vector<128x128xbf16>
    %cst = arith.constant dense<0.000000e+00> : vector<16x128xf32>
    %5 = tpu.matmul %3, %4, %cst {dimension_numbers = #tpu.dot_dimension_numbers<[1], [0], [0], [1], [0, 0, 1, 1], [], []>} : vector<16x128xbf16>, vector<128x128xbf16>, vector<16x128xf32> -> vector<16x128xf32>
    %c0_4 = arith.constant 0 : index
    %c0_5 = arith.constant 0 : index
    %6 = vector.load %arg4[%c0_4, %c0_5] : memref<1x128xf32, #tpu.memory_space<vmem>>, vector<1x128xf32>
    %7 = vector.broadcast %6 : vector<1x128xf32> to vector<16x128xf32>
    %8 = arith.addf %5, %7 : vector<16x128xf32>
    %cst_6 = arith.constant 0.000000e+00 : f32
    %9 = vector.broadcast %cst_6 : f32 to vector<16x128xf32>
    %10 = arith.maximumf %8, %9 : vector<16x128xf32>
    %c0_7 = arith.constant 0 : index
    %c0_8 = arith.constant 0 : index
    %11 = vector.load %arg8[%c0_7, %c0_8] : memref<16x128xf32, #tpu.memory_space<vmem>>, vector<16x128xf32>
    %12 = arith.truncf %10 : vector<16x128xf32> to vector<16x128xbf16>
    %c0_9 = arith.constant 0 : index
    %c0_10 = arith.constant 0 : index
    %13 = vector.load %arg5[%c0_9, %c0_10] : memref<128x128xbf16, #tpu.memory_space<vmem>>, vector<128x128xbf16>
    %cst_11 = arith.constant dense<0.000000e+00> : vector<16x128xf32>
    %14 = tpu.matmul %12, %13, %cst_11 {dimension_numbers = #tpu.dot_dimension_numbers<[1], [0], [0], [1], [0, 0, 1, 1], [], []>} : vector<16x128xbf16>, vector<128x128xbf16>, vector<16x128xf32> -> vector<16x128xf32>
    %15 = arith.addf %11, %14 : vector<16x128xf32>
    %c0_12 = arith.constant 0 : index
    %c0_13 = arith.constant 0 : index
    %16 = vector.load %arg8[%c0_12, %c0_13] : memref<16x128xf32, #tpu.memory_space<vmem>>, vector<16x128xf32>
    tpu.vector_store %arg8[%c0_12, %c0_13], %15 {strides = array<i32>} : memref<16x128xf32, #tpu.memory_space<vmem>>, vector<16x128xf32>,
    %c0_i32_14 = arith.constant 0 : i32
    %17 = arith.cmpi eq, %arg1, %c0_i32_14 : i32
    %18 = arith.extui %17 : i1 to i32
    %c0_i32_15 = arith.constant 0 : i32
    %19 = arith.cmpi ne, %18, %c0_i32_15 : i32
    scf.if %19 {
      %c0_16 = arith.constant 0 : index
      %c0_17 = arith.constant 0 : index
      %20 = vector.load %arg8[%c0_16, %c0_17] : memref<16x128xf32, #tpu.memory_space<vmem>>, vector<16x128xf32>
      %c0_18 = arith.constant 0 : index
      %c0_19 = arith.constant 0 : index
      %21 = vector.load %arg6[%c0_18, %c0_19] : memref<1x128xf32, #tpu.memory_space<vmem>>, vector<1x128xf32>
      %22 = vector.broadcast %21 : vector<1x128xf32> to vector<16x128xf32>
      %23 = arith.addf %20, %22 : vector<16x128xf32>
      %c0_20 = arith.constant 0 : index
      %c0_21 = arith.constant 0 : index
      %24 = vector.load %arg7[%c0_20, %c0_21] : memref<16x128xf32, #tpu.memory_space<vmem>>, vector<16x128xf32>
      tpu.vector_store %arg7[%c0_20, %c0_21], %23 {strides = array<i32>} : memref<16x128xf32, #tpu.memory_space<vmem>>, vector<16x128xf32>,
    } else {
    }
    return
  }
  func.func @transform_0(%arg0: i32, %arg1: i32) -> (i32, i32) {
    %c0_i32 = arith.constant 0 : i32
    %c0_i32_0 = arith.constant 0 : i32
    return %arg0, %c0_i32 : i32, i32
  }
  func.func @transform_1(%arg0: i32, %arg1: i32) -> (i32, i32) {
    %c2_i32 = arith.constant 2 : i32
    %c0_i32 = arith.constant 0 : i32
    %0 = arith.cmpi eq, %c2_i32, %c0_i32 : i32
    %c1_i32 = arith.constant 1 : i32
    %1 = arith.select %0, %c1_i32, %c2_i32 : i32
    %2 = arith.remsi %arg0, %1 : i32
    %c0_i32_0 = arith.constant 0 : i32
    %3 = arith.cmpi ne, %2, %c0_i32_0 : i32
    %c0_i32_1 = arith.constant 0 : i32
    %4 = arith.cmpi slt, %2, %c0_i32_1 : i32
    %c0_i32_2 = arith.constant 0 : i32
    %5 = arith.cmpi slt, %1, %c0_i32_2 : i32
    %6 = arith.xori %4, %5 : i1
    %7 = arith.andi %6, %3 : i1
    %8 = arith.addi %2, %1 : i32
    %9 = arith.select %7, %8, %2 : i32
    %c2_i32_3 = arith.constant 2 : i32
    %10 = arith.muli %c2_i32_3, %arg1 : i32
    %c0_i32_4 = arith.constant 0 : i32
    %11 = arith.subi %c0_i32_4, %10 : i32
    %12 = arith.muli %9, %11 : i32
    %13 = arith.addi %arg1, %12 : i32
    %c0_i32_5 = arith.constant 0 : i32
    %c0_i32_6 = arith.constant 0 : i32
    return %c0_i32_5, %13 : i32, i32
  }
  func.func @transform_2(%arg0: i32, %arg1: i32) -> (i32, i32) {
    %c2_i32 = arith.constant 2 : i32
    %c0_i32 = arith.constant 0 : i32
    %0 = arith.cmpi eq, %c2_i32, %c0_i32 : i32
    %c1_i32 = arith.constant 1 : i32
    %1 = arith.select %0, %c1_i32, %c2_i32 : i32
    %2 = arith.remsi %arg0, %1 : i32
    %c0_i32_0 = arith.constant 0 : i32
    %3 = arith.cmpi ne, %2, %c0_i32_0 : i32
    %c0_i32_1 = arith.constant 0 : i32
    %4 = arith.cmpi slt, %2, %c0_i32_1 : i32
    %c0_i32_2 = arith.constant 0 : i32
    %5 = arith.cmpi slt, %1, %c0_i32_2 : i32
    %6 = arith.xori %4, %5 : i1
    %7 = arith.andi %6, %3 : i1
    %8 = arith.addi %2, %1 : i32
    %9 = arith.select %7, %8, %2 : i32
    %c2_i32_3 = arith.constant 2 : i32
    %10 = arith.muli %c2_i32_3, %arg1 : i32
    %c0_i32_4 = arith.constant 0 : i32
    %11 = arith.subi %c0_i32_4, %10 : i32
    %12 = arith.muli %9, %11 : i32
    %13 = arith.addi %arg1, %12 : i32
    %c0_i32_5 = arith.constant 0 : i32
    %c0_i32_6 = arith.constant 0 : i32
    return %c0_i32_5, %13 : i32, i32
  }
  func.func @transform_3(%arg0: i32, %arg1: i32) -> (i32, i32) {
    %c2_i32 = arith.constant 2 : i32
    %c0_i32 = arith.constant 0 : i32
    %0 = arith.cmpi eq, %c2_i32, %c0_i32 : i32
    %c1_i32 = arith.constant 1 : i32
    %1 = arith.select %0, %c1_i32, %c2_i32 : i32
    %2 = arith.remsi %arg0, %1 : i32
    %c0_i32_0 = arith.constant 0 : i32
    %3 = arith.cmpi ne, %2, %c0_i32_0 : i32
    %c0_i32_1 = arith.constant 0 : i32
    %4 = arith.cmpi slt, %2, %c0_i32_1 : i32
    %c0_i32_2 = arith.constant 0 : i32
    %5 = arith.cmpi slt, %1, %c0_i32_2 : i32
    %6 = arith.xori %4, %5 : i1
    %7 = arith.andi %6, %3 : i1
    %8 = arith.addi %2, %1 : i32
    %9 = arith.select %7, %8, %2 : i32
    %c2_i32_3 = arith.constant 2 : i32
    %10 = arith.muli %c2_i32_3, %arg1 : i32
    %c0_i32_4 = arith.constant 0 : i32
    %11 = arith.subi %c0_i32_4, %10 : i32
    %12 = arith.muli %9, %11 : i32
    %13 = arith.addi %arg1, %12 : i32
    %c0_i32_5 = arith.constant 0 : i32
    %c0_i32_6 = arith.constant 0 : i32
    return %13, %c0_i32_5 : i32, i32
  }
  func.func @transform_4(%arg0: i32, %arg1: i32) -> (i32, i32) {
    %c0_i32 = arith.constant 0 : i32
    %c0_i32_0 = arith.constant 0 : i32
    %c0_i32_1 = arith.constant 0 : i32
    return %c0_i32, %c0_i32_0 : i32, i32
  }
  func.func @transform_5(%arg0: i32, %arg1: i32) -> (i32, i32) {
    %c0_i32 = arith.constant 0 : i32
    %c0_i32_0 = arith.constant 0 : i32
    return %arg0, %c0_i32 : i32, i32
  }
}

</mosaic_0001>

<bundles_post_ra>
// kernel: feed_forward.1
= control target key start
LH: loop header
LB: loop body
LE: loop exit
PB: predicated region body
PF: predicated region fallthrough
CT: control target
= control target key end

     0   :  { %v610_v0 = vmov 0.0   ;;  %vm611_vm0 = vmmov 0   ;;  %s705_s1 = inlined_call_operand.vmem [shape: bf16[128,128], index: 1, kind: input, shape index: {}]   ;;  %s706_s3 = inlined_call_operand.vmem [shape: bf16[128,128], index: 3, kind: input, shape index: {}]   ;;  %s707_s0 = inlined_call_operand.vmem [shape: bf16[16,128], index: 0, kind: input, shape index: {}]   ;;  %s708_s2 = inlined_call_operand.vmem [shape: f32[1,128], index: 2, kind: input, shape index: {}]   ;;  %s709_s4 = inlined_call_operand.vmem [shape: f32[1,128], index: 4, kind: input, shape index: {}]   ;;  %s710_s5 = inlined_call_operand.vmem [shape: f32[16,128], index: 5, kind: output, shape index: {}]  }
   0x1   :  { %551 = vmatprep.subr.bf16.mxu0 %v610_v0  ;;  %v593_v1 = vld [vmem:[%s705_s1] sm:$0xff]   ;;  %567 = vmatprep.mubr.msk.bf16.mxu0 %vm611_vm0, %v610_v0  ;;  %v594_v2 = vld [vmem:[%s705_s1 + $0x8] sm:$0xff]   ;;  %v595_v3 = vld [vmem:[%s705_s1 + $0x10] sm:$0xff]  }
   0x2   :  { %571 = vmatprep.subr.bf16.mxu1 %v610_v0  ;;  %587 = vmatprep.mubr.msk.bf16.mxu1 %vm611_vm0, %v610_v0  ;;  %v602_v4 = vld [vmem:[%s706_s3] sm:$0xff]   ;;  %v596_v5 = vld [vmem:[%s705_s1 + $0x18] sm:$0xff]   ;;  %v603_v6 = vld [vmem:[%s706_s3 + $0x8] sm:$0xff]  }
   0x3   :  { %552 = vmatpush3.bf16.msra.mxu0 %v593_v1  ;;  %572 = vmatpush3.bf16.msra.mxu1 %v602_v4  ;;  %v597_v7 = vld [vmem:[%s705_s1 + $0x20] sm:$0xff]   ;;  %v604_v8 = vld [vmem:[%s706_s3 + $0x10] sm:$0xff]   ;;  %v598_v9 = vld [vmem:[%s705_s1 + $0x28] sm:$0xff]  }
   0x4   :  { %553 = vmatprep.subr.bf16.mxu0 %v610_v0  ;;  %573 = vmatprep.subr.bf16.mxu1 %v610_v0  ;;  %v605_v10 = vld [vmem:[%s706_s3 + $0x18] sm:$0xff]   ;;  %v599_v11 = vld [vmem:[%s705_s1 + $0x30] sm:$0xff]   ;;  %v606_v12 = vld [vmem:[%s706_s3 + $0x20] sm:$0xff]  }
   0x5   :  { %v600_v13 = vld [vmem:[%s705_s1 + $0x38] sm:$0xff]   ;;  %v607_v14 = vld [vmem:[%s706_s3 + $0x28] sm:$0xff]   ;;  %v601_v15 = vld [vmem:[%s707_s0] sm:$0xff]  }
   0x6   :  { %v608_v16 = vld [vmem:[%s706_s3 + $0x30] sm:$0xff]   ;;  %v609_v17 = vld [vmem:[%s706_s3 + $0x38] sm:$0xff]   ;;  %v514_v18 = vld [vmem:[%s708_s2] ss:$0 sm:$0xff] }
   0x7   :  { %554 = vmatpush3.bf16.msra.mxu0 %v594_v2  ;;  %574 = vmatpush3.bf16.msra.mxu1 %v603_v6  ;;  %v532_v28 = vld [vmem:[%s709_s4] ss:$0 sm:$0xff] }
   0x8   :  { %555 = vmatprep.subr.bf16.mxu0 %v610_v0  ;;  %575 = vmatprep.subr.bf16.mxu1 %v610_v0 }
   0xb   :  { %556 = vmatpush3.bf16.msra.mxu0 %v595_v3  ;;  %576 = vmatpush3.bf16.msra.mxu1 %v604_v8 }
   0xc   :  { %557 = vmatprep.subr.bf16.mxu0 %v610_v0  ;;  %577 = vmatprep.subr.bf16.mxu1 %v610_v0 }
   0xf   :  { %558 = vmatpush3.bf16.msra.mxu0 %v596_v5  ;;  %578 = vmatpush3.bf16.msra.mxu1 %v605_v10 }
  0x10   :  { %559 = vmatprep.subr.bf16.mxu0 %v610_v0  ;;  %579 = vmatprep.subr.bf16.mxu1 %v610_v0 }
  0x13   :  { %560 = vmatpush3.bf16.msra.mxu0 %v597_v7  ;;  %580 = vmatpush3.bf16.msra.mxu1 %v606_v12 }
  0x14   :  { %561 = vmatprep.subr.bf16.mxu0 %v610_v0  ;;  %581 = vmatprep.subr.bf16.mxu1 %v610_v0 }
  0x17   :  { %562 = vmatpush3.bf16.msra.mxu0 %v598_v9  ;;  %582 = vmatpush3.bf16.msra.mxu1 %v607_v14 }
  0x18   :  { %563 = vmatprep.subr.bf16.mxu0 %v610_v0  ;;  %583 = vmatprep.subr.bf16.mxu1 %v610_v0 }
  0x1b   :  { %564 = vmatpush3.bf16.msra.mxu0 %v599_v11  ;;  %584 = vmatpush3.bf16.msra.mxu1 %v608_v16 }
  0x1c   :  { %565 = vmatprep.subr.bf16.mxu0 %v610_v0  ;;  %585 = vmatprep.subr.bf16.mxu1 %v610_v0 }
  0x1f   :  { %566 = vmatpush3.bf16.msra.mxu0 %v600_v13  ;;  %586 = vmatpush3.bf16.msra.mxu1 %v609_v17 }
  0x22   :  { %568 = vmatmul.mubr.bf16.vlgmr.msra.gmra.mrb[0].mxu0 %v601_v15 }
  0xf5   :  { %v358_v19 = vpop.f32.mrb[0].mxu0 }
  0xf6   :  { %v359_v20 = vadd.f32 %v514_v18, %v358_v19  ;;  %v569_v21 = vpop.f32.mrb[1].mxu0 }
  0xf7   :  { %v361_v22 = vpop.f32.mrb[2].mxu0 }
  0xf8   :  { %v362_v23 = vadd.f32 %v514_v18, %v361_v22  ;;  %v570_v24 = vpop.f32.mrb[3].mxu0  ;;  %v365_v25 = vmax.f32 %v359_v20, 0.0 }
  0xfa   :  { %v366_v26 = vmax.f32 %v362_v23, 0.0 }
  0xfc   :  { %v369_v27 = vpack.c.bf16 %v366_v26, %v365_v25 }
  0xfe   :  { %588 = vmatmul.mubr.bf16.vlgmr.msra.gmra.mrb[0].mxu1 %v369_v27 }
 0x1d1   :  { %v468_v29 = vpop.f32.mrb[0].mxu1 }
 0x1d2   :  { %v491_v30 = vadd.f32 %v532_v28, %v468_v29  ;;  %v589_v31 = vpop.f32.mrb[1].mxu1 }
 0x1d3   :  { %v471_v32 = vpop.f32.mrb[2].mxu1 }
 0x1d4   :  { %493 = vst [vmem:[%s710_s5] sm:$0xff] %v491_v30  ;;  %v492_v33 = vadd.f32 %v532_v28, %v471_v32  ;;  %v590_v34 = vpop.f32.mrb[3].mxu1 }
 0x1d6   :  { %494 = vst [vmem:[%s710_s5 + $0x8] sm:$0xff] %v492_v33 }

</bundles_post_ra>
